<compile_context>
chip_gen: v5e
topology: v5e:2x2
jax: 0.10.0
libtpu: 0.0.40
codegen_flags: <defaults>
</compile_context>

<pallas_src>
import jax
import jax.numpy as jnp
from jax.experimental import pallas as pl
from jax.experimental.pallas import tpu as pltpu


def _l3_tanh_lr_kernel(xT_ref,
                       w1_ref, b1_ref,
                       w2_ref, b2_ref,
                       w3_ref, b3_ref,
                       w4_ref, b4_ref,
                       oT_ref):
    # Batch on lanes, feature dims on sublanes. All weights/biases VMEM-resident.
    x = xT_ref[...]  # (in, TB), already f32 -> no redundant astype
    h = jnp.tanh(jnp.dot(w1_ref[...], x, preferred_element_type=jnp.float32)
                 + b1_ref[...])
    h = jnp.tanh(jnp.dot(w2_ref[...], h, preferred_element_type=jnp.float32)
                 + b2_ref[...])
    h = jnp.tanh(jnp.dot(w3_ref[...], h, preferred_element_type=jnp.float32)
                 + b3_ref[...])
    out = jnp.dot(w4_ref[...], h, preferred_element_type=jnp.float32) + b4_ref[...]
    oT_ref[...] = out.astype(oT_ref.dtype)


def l3_tanh_lr(x, params, *, batch_tile=512):
    """x: (B, in_features). params: torch-layout weights w_k (out, in), biases b_k (out,)."""
    B, in_features = x.shape
    out_features = params["w4"].shape[0]

    # Batch tiling: one full-block grid point for small B; otherwise tile at
    # `batch_tile` (multiple of 128 -> lane-dense, >=85% of HBM roofline per
    # measurements) and pad the batch up to a tile multiple.
    if B <= batch_tile:
        tb = B
        b_pad = B
    else:
        tb = batch_tile
        b_pad = pl.cdiv(B, tb) * tb

    xT = x.T  # (in_features, B) -> batch on lanes
    if b_pad != B:
        xT = jnp.pad(xT, ((0, 0), (0, b_pad - B)))

    weight_args = (
        params["w1"], params["b1"][:, None],
        params["w2"], params["b2"][:, None],
        params["w3"], params["b3"][:, None],
        params["w4"], params["b4"][:, None],
    )

    # NOTE: build specs explicitly (no late-binding lambda-over-loop-variable bug).
    x_spec = pl.BlockSpec((in_features, tb), lambda i: (0, i))
    weight_specs = [
        pl.BlockSpec(a.shape, lambda i: (0, 0))  # full array, resident across grid
        for a in weight_args
    ]
    out_spec = pl.BlockSpec((out_features, tb), lambda i: (0, i))

    outT = pl.pallas_call(
        _l3_tanh_lr_kernel,
        grid=(b_pad // tb,),
        in_specs=[x_spec] + weight_specs,
        out_specs=out_spec,
        out_shape=jax.ShapeDtypeStruct((out_features, b_pad), x.dtype),
        compiler_params=pltpu.CompilerParams(
            dimension_semantics=("parallel",)),
    )(xT, *weight_args)

    return outT[:, :B].T  # back to (B, out_features)


def init_params(key, in_features=2, hidden_dim=4, out_features=1):
    """torch.nn.Linear-style init: weights (out, in), uniform +-1/sqrt(fan_in)."""
    dims = [(in_features, hidden_dim),
            (hidden_dim, hidden_dim),
            (hidden_dim, hidden_dim),
            (hidden_dim, out_features)]
    params = {}
    for i, (fan_in, fan_out) in enumerate(dims, start=1):
        key, kw, kb = jax.random.split(key, 3)
        bound = 1.0 / jnp.sqrt(float(fan_in))
        params[f"w{i}"] = jax.random.uniform(
            kw, (fan_out, fan_in), jnp.float32, -bound, bound)
        params[f"b{i}"] = jax.random.uniform(
            kb, (fan_out,), jnp.float32, -bound, bound)
    return params


def reference(x, params):
    h = jnp.tanh(x @ params["w1"].T + params["b1"])
    h = jnp.tanh(h @ params["w2"].T + params["b2"])
    h = jnp.tanh(h @ params["w3"].T + params["b3"])
    return h @ params["w4"].T + params["b4"]


if __name__ == "__main__":
    key = jax.random.PRNGKey(0)
    key, kx, kx2 = jax.random.split(key, 3)

    B, IN, HID, OUT = 8, 2, 4, 1
    params = init_params(key, IN, HID, OUT)

    # Small batch: single full-block grid point.
    x = jax.random.normal(kx, (B, IN), jnp.float32)
    out = jax.block_until_ready(l3_tanh_lr(x, params))
    ref = reference(x, params)
    assert out.shape == (B, OUT)
    assert jnp.allclose(out, ref, atol=1e-5, rtol=1e-5)

    # Larger batch: exercises the tiled + padded grid path (3 tiles of 512).
    B2 = 1300
    x2 = jax.random.normal(kx2, (B2, IN), jnp.float32)
    out2 = jax.block_until_ready(l3_tanh_lr(x2, params))
    ref2 = reference(x2, params)
    assert out2.shape == (B2, OUT)
    assert jnp.allclose(out2, ref2, atol=1e-5, rtol=1e-5)

    print("KERNEL_OK")
</pallas_src>

<mosaic_0001>
module attributes {stable_mosaic.version = 11 : i64} {
  func.func @_l3_tanh_lr_kernel(%arg0: i32, %arg1: memref<2x8xf32, #tpu.memory_space<vmem>>, %arg2: memref<4x2xf32, #tpu.memory_space<vmem>>, %arg3: memref<4x1xf32, #tpu.memory_space<vmem>>, %arg4: memref<4x4xf32, #tpu.memory_space<vmem>>, %arg5: memref<4x1xf32, #tpu.memory_space<vmem>>, %arg6: memref<4x4xf32, #tpu.memory_space<vmem>>, %arg7: memref<4x1xf32, #tpu.memory_space<vmem>>, %arg8: memref<1x4xf32, #tpu.memory_space<vmem>>, %arg9: memref<1x1xf32, #tpu.memory_space<vmem>>, %arg10: memref<1x8xf32, #tpu.memory_space<vmem>>) attributes {dimension_semantics = [#tpu.dimension_semantics<parallel>], iteration_bounds = array<i64: 1>, scalar_prefetch = 0 : i64, scratch_operands = 0 : i64, tpu.core_type = #tpu.core_type<tc>, window_params = [{transform_indices = @transform_0, window_bounds = array<i64: 2, 8>}, {pipeline_mode = #tpu.pipeline_mode<synchronous>, transform_indices = @transform_1, window_bounds = array<i64: 4, 2>}, {pipeline_mode = #tpu.pipeline_mode<synchronous>, transform_indices = @transform_2, window_bounds = array<i64: 4, 1>}, {pipeline_mode = #tpu.pipeline_mode<synchronous>, transform_indices = @transform_3, window_bounds = array<i64: 4, 4>}, {pipeline_mode = #tpu.pipeline_mode<synchronous>, transform_indices = @transform_4, window_bounds = array<i64: 4, 1>}, {pipeline_mode = #tpu.pipeline_mode<synchronous>, transform_indices = @transform_5, window_bounds = array<i64: 4, 4>}, {pipeline_mode = #tpu.pipeline_mode<synchronous>, transform_indices = @transform_6, window_bounds = array<i64: 4, 1>}, {pipeline_mode = #tpu.pipeline_mode<synchronous>, transform_indices = @transform_7, window_bounds = array<i64: 1, 4>}, {pipeline_mode = #tpu.pipeline_mode<synchronous>, transform_indices = @transform_8, window_bounds = array<i64: 1, 1>}, {transform_indices = @transform_9, window_bounds = array<i64: 1, 8>}]} {
    %c0 = arith.constant 0 : index
    %c0_0 = arith.constant 0 : index
    %0 = vector.load %arg1[%c0, %c0_0] : memref<2x8xf32, #tpu.memory_space<vmem>>, vector<2x8xf32>
    %c0_1 = arith.constant 0 : index
    %c0_2 = arith.constant 0 : index
    %1 = vector.load %arg2[%c0_1, %c0_2] : memref<4x2xf32, #tpu.memory_space<vmem>>, vector<4x2xf32>
    %cst = arith.constant dense<0.000000e+00> : vector<4x8xf32>
    %2 = tpu.matmul %1, %0, %cst {dimension_numbers = #tpu.dot_dimension_numbers<[1], [0], [0], [1], [0, 0, 1, 1], [], []>} : vector<4x2xf32>, vector<2x8xf32>, vector<4x8xf32> -> vector<4x8xf32>
    %c0_3 = arith.constant 0 : index
    %c0_4 = arith.constant 0 : index
    %3 = vector.load %arg3[%c0_3, %c0_4] : memref<4x1xf32, #tpu.memory_space<vmem>>, vector<4x1xf32>
    %4 = vector.broadcast %3 : vector<4x1xf32> to vector<4x8xf32>
    %5 = arith.addf %2, %4 : vector<4x8xf32>
    %6 = math.tanh %5 : vector<4x8xf32>
    %c0_5 = arith.constant 0 : index
    %c0_6 = arith.constant 0 : index
    %7 = vector.load %arg4[%c0_5, %c0_6] : memref<4x4xf32, #tpu.memory_space<vmem>>, vector<4x4xf32>
    %cst_7 = arith.constant dense<0.000000e+00> : vector<4x8xf32>
    %8 = tpu.matmul %7, %6, %cst_7 {dimension_numbers = #tpu.dot_dimension_numbers<[1], [0], [0], [1], [0, 0, 1, 1], [], []>} : vector<4x4xf32>, vector<4x8xf32>, vector<4x8xf32> -> vector<4x8xf32>
    %c0_8 = arith.constant 0 : index
    %c0_9 = arith.constant 0 : index
    %9 = vector.load %arg5[%c0_8, %c0_9] : memref<4x1xf32, #tpu.memory_space<vmem>>, vector<4x1xf32>
    %10 = vector.broadcast %9 : vector<4x1xf32> to vector<4x8xf32>
    %11 = arith.addf %8, %10 : vector<4x8xf32>
    %12 = math.tanh %11 : vector<4x8xf32>
    %c0_10 = arith.constant 0 : index
    %c0_11 = arith.constant 0 : index
    %13 = vector.load %arg6[%c0_10, %c0_11] : memref<4x4xf32, #tpu.memory_space<vmem>>, vector<4x4xf32>
    %cst_12 = arith.constant dense<0.000000e+00> : vector<4x8xf32>
    %14 = tpu.matmul %13, %12, %cst_12 {dimension_numbers = #tpu.dot_dimension_numbers<[1], [0], [0], [1], [0, 0, 1, 1], [], []>} : vector<4x4xf32>, vector<4x8xf32>, vector<4x8xf32> -> vector<4x8xf32>
    %c0_13 = arith.constant 0 : index
    %c0_14 = arith.constant 0 : index
    %15 = vector.load %arg7[%c0_13, %c0_14] : memref<4x1xf32, #tpu.memory_space<vmem>>, vector<4x1xf32>
    %16 = vector.broadcast %15 : vector<4x1xf32> to vector<4x8xf32>
    %17 = arith.addf %14, %16 : vector<4x8xf32>
    %18 = math.tanh %17 : vector<4x8xf32>
    %c0_15 = arith.constant 0 : index
    %c0_16 = arith.constant 0 : index
    %19 = vector.load %arg8[%c0_15, %c0_16] : memref<1x4xf32, #tpu.memory_space<vmem>>, vector<1x4xf32>
    %cst_17 = arith.constant dense<0.000000e+00> : vector<1x8xf32>
    %20 = tpu.matmul %19, %18, %cst_17 {dimension_numbers = #tpu.dot_dimension_numbers<[1], [0], [0], [1], [0, 0, 1, 1], [], []>} : vector<1x4xf32>, vector<4x8xf32>, vector<1x8xf32> -> vector<1x8xf32>
    %c0_18 = arith.constant 0 : index
    %c0_19 = arith.constant 0 : index
    %21 = vector.load %arg9[%c0_18, %c0_19] : memref<1x1xf32, #tpu.memory_space<vmem>>, vector<1x1xf32>
    %22 = vector.broadcast %21 : vector<1x1xf32> to vector<1x8xf32>
    %23 = arith.addf %20, %22 : vector<1x8xf32>
    %c0_20 = arith.constant 0 : index
    %c0_21 = arith.constant 0 : index
    %24 = vector.load %arg10[%c0_20, %c0_21] : memref<1x8xf32, #tpu.memory_space<vmem>>, vector<1x8xf32>
    tpu.vector_store %arg10[%c0_20, %c0_21], %23 {strides = array<i32>} : memref<1x8xf32, #tpu.memory_space<vmem>>, vector<1x8xf32>,
    return
  }
  func.func @transform_0(%arg0: i32) -> (i32, i32) {
    %c0_i32 = arith.constant 0 : i32
    %c0_i32_0 = arith.constant 0 : i32
    return %c0_i32, %arg0 : i32, i32
  }
  func.func @transform_1(%arg0: i32) -> (i32, i32) {
    %c0_i32 = arith.constant 0 : i32
    %c0_i32_0 = arith.constant 0 : i32
    %c0_i32_1 = arith.constant 0 : i32
    return %c0_i32, %c0_i32_0 : i32, i32
  }
  func.func @transform_2(%arg0: i32) -> (i32, i32) {
    %c0_i32 = arith.constant 0 : i32
    %c0_i32_0 = arith.constant 0 : i32
    %c0_i32_1 = arith.constant 0 : i32
    return %c0_i32, %c0_i32_0 : i32, i32
  }
  func.func @transform_3(%arg0: i32) -> (i32, i32) {
    %c0_i32 = arith.constant 0 : i32
    %c0_i32_0 = arith.constant 0 : i32
    %c0_i32_1 = arith.constant 0 : i32
    return %c0_i32, %c0_i32_0 : i32, i32
  }
  func.func @transform_4(%arg0: i32) -> (i32, i32) {
    %c0_i32 = arith.constant 0 : i32
    %c0_i32_0 = arith.constant 0 : i32
    %c0_i32_1 = arith.constant 0 : i32
    return %c0_i32, %c0_i32_0 : i32, i32
  }
  func.func @transform_5(%arg0: i32) -> (i32, i32) {
    %c0_i32 = arith.constant 0 : i32
    %c0_i32_0 = arith.constant 0 : i32
    %c0_i32_1 = arith.constant 0 : i32
    return %c0_i32, %c0_i32_0 : i32, i32
  }
  func.func @transform_6(%arg0: i32) -> (i32, i32) {
    %c0_i32 = arith.constant 0 : i32
    %c0_i32_0 = arith.constant 0 : i32
    %c0_i32_1 = arith.constant 0 : i32
    return %c0_i32, %c0_i32_0 : i32, i32
  }
  func.func @transform_7(%arg0: i32) -> (i32, i32) {
    %c0_i32 = arith.constant 0 : i32
    %c0_i32_0 = arith.constant 0 : i32
    %c0_i32_1 = arith.constant 0 : i32
    return %c0_i32, %c0_i32_0 : i32, i32
  }
  func.func @transform_8(%arg0: i32) -> (i32, i32) {
    %c0_i32 = arith.constant 0 : i32
    %c0_i32_0 = arith.constant 0 : i32
    %c0_i32_1 = arith.constant 0 : i32
    return %c0_i32, %c0_i32_0 : i32, i32
  }
  func.func @transform_9(%arg0: i32) -> (i32, i32) {
    %c0_i32 = arith.constant 0 : i32
    %c0_i32_0 = arith.constant 0 : i32
    return %c0_i32, %arg0 : i32, i32
  }
}

</mosaic_0001>

<bundles_post_ra>
// kernel: tpu_custom_call.1
= control target key start
LH: loop header
LB: loop body
LE: loop exit
PB: predicated region body
PF: predicated region fallthrough
CT: control target
= control target key end

     0   :  { %s326_s0 = inlined_call_operand.vmem [shape: f32[2,8], index: 0, kind: input, shape index: {}]   ;;  %s327_s1 = inlined_call_operand.vmem [shape: f32[4,2], index: 1, kind: input, shape index: {}]   ;;  %s328_s2 = inlined_call_operand.vmem [shape: f32[4,1], index: 2, kind: input, shape index: {}]   ;;  %s329_s3 = inlined_call_operand.vmem [shape: f32[4,4], index: 3, kind: input, shape index: {}]   ;;  %s330_s4 = inlined_call_operand.vmem [shape: f32[4,1], index: 4, kind: input, shape index: {}]   ;;  %s331_s5 = inlined_call_operand.vmem [shape: f32[4,4], index: 5, kind: input, shape index: {}]   ;;  %s332_s6 = inlined_call_operand.vmem [shape: f32[4,1], index: 6, kind: input, shape index: {}]   ;;  %s333_s7 = inlined_call_operand.vmem [shape: f32[1,4], index: 7, kind: input, shape index: {}]   ;;  %s334_s8 = inlined_call_operand.<no memory space> [shape: f32[1,1], index: 8, kind: input, shape index: {}]   ;;  %s335_s9 = inlined_call_operand.hbm [shape: f32[1,8], index: 9, kind: output, shape index: {}]  }
   0x1   :  { %v14_v0 = vstv %s334_s8 }
   0x2   :  { %15 = vst [vmem:[#allocation2] sm:$0x1] %v14_v0 }
   0x3   :  { %v35_v1 = vld [vmem:[%s326_s0] sm:$0x3]  ;;  %vm47_vm0 = vcmask 1041408   ;;  %vm43_vm1 = vcmask 15360   ;;  %v238_v4 = vmov 0  }
   0x4   :  { %v36_v2 = vld [vmem:[%s327_s1] sm:$0xf]  ;;  %194 = vmatpush.msk.msra.mxu0 %vm47_vm0, %v35_v1  ;;  %204 = vset.pattern.permute.xlu0 %v238_v4 }
   0x5   :  { %v37_v3 = vld [vmem:[%s328_s2] sm:$0xf]  ;;  %195 = vmatmul.msk.f32.vlgmr.msra.gmra.mxu0 %vm43_vm1, %v36_v2 }
   0x6   :  { %16 = vsyncpa [#allocation4], 0  ;;  %40 = vperm.xlu0 %204, %v37_v3   ;;  %205 = vset.pattern.permute.xlu1 %v238_v4  ;;  %v73_v5 = vld [vmem:[%s330_s4] sm:$0xf]  ;;  %vm83_vm2 = vcmask 1043456   ;;  %vm79_vm3 = vcmask 31744  }
   0x7   :  { %v72_v9 = vld [vmem:[%s329_s3] sm:$0xf]  ;;  %s185_s23 = sshll.u32 %s335_s9, 4  ;;  %vm176_vm4 = vcmask 57344   ;;  %s186_s23 = int_to_ptr.hbm [resolvable:$true] %s185_s23 }
   0x8   :  { %v109_v11 = vld [vmem:[%s332_s6] sm:$0xf] }
   0x9   :  { %112 = vperm.xlu1 %205, %v109_v11   ;;  %v143_v12 = vld [vmem:[#allocation2] sm:$0x1] }
   0xa   :  { %v108_v16 = vld [vmem:[%s331_s5] sm:$0xf]  ;;  %s239_s5 = smov [#allocation3]  }
   0xb   :  { %v142_v21 = vld [vmem:[%s333_s7] sm:$0x1]  ;;  %s183_s20 = sshll.u32 %s239_s5, 4  ;;  %s184_s20 = int_to_ptr.vmem [resolvable:$true] %s183_s20 }
   0xe   :  { %76 = vperm.xlu0 %204, %v73_v5  }
  0x11   :  { %146 = vperm.xlu1 %205, %v143_v12  }
  0x78   :  { %v41_v6 = vpop.permute.xlu0 %40 }
  0x7b   :  { %v113_v18 = vpop.permute.xlu1 %112 }
  0x80   :  { %v77_v13 = vpop.permute.xlu0 %76 }
  0x82   :  { %v68_v7 = vpop.f32.mrf.mxu0 }
  0x83   :  { %v69_v8 = vadd.f32 %v68_v7, %v41_v6  ;;  %v147_v23 = vpop.permute.xlu1 %146 }
  0x84   :  { %v149_v24 = vperm.slane %v147_v23, 0 }
  0x85   :  { %206 = vtanh.f32 %v69_v8 }
  0x8b   :  { %v207_v10 = vpop.eup %206 }
  0x8c   :  { %196 = vmatpush.msk.msra.mxu1 %vm83_vm2, %v207_v10 }
  0x8d   :  { %197 = vmatmul.msk.f32.vlgmr.msra.gmra.mxu1 %vm79_vm3, %v72_v9 }
 0x10a   :  { %v104_v14 = vpop.f32.mrf.mxu1 }
 0x10b   :  { %v105_v15 = vadd.f32 %v104_v14, %v77_v13 }
 0x10d   :  { %208 = vtanh.f32 %v105_v15 }
 0x113   :  { %v209_v17 = vpop.eup %208 }
 0x114   :  { %198 = vmatpush.msk.msra.mxu2 %vm83_vm2, %v209_v17 }
 0x115   :  { %199 = vmatmul.msk.f32.vlgmr.msra.gmra.mxu2 %vm79_vm3, %v108_v16 }
 0x198   :  { %v138_v19 = vpop.f32.mrf.mxu2 }
 0x199   :  { %v139_v20 = vadd.f32 %v138_v19, %v113_v18 }
 0x19b   :  { %210 = vtanh.f32 %v139_v20 }
 0x1a1   :  { %v211_v22 = vpop.eup %210 }
 0x1a2   :  { %200 = vmatpush.msk.msra.mxu3 %vm83_vm2, %v211_v22 }
 0x1a3   :  { %201 = vmatmul.msk.f32.vlgmr.msra.gmra.mxu3 %vm79_vm3, %v142_v21 }
 0x226   :  { %v173_v25 = vpop.f32.mrf.mxu3 }
 0x227   :  { %v174_v26 = vadd.f32 %v173_v25, %v149_v24 }
 0x229   :  { %177 = vst.msk [vmem:[#allocation3] sm:$0x1] %vm176_vm4, %v174_v26 }
 0x22a   :  { %188 = dma.vmem_to_hbm [thread:$0]  %s184_s20, 16, %s186_s23, [#allocation4]  }
 0x22b   :  { %236 = dma.done.wait [#allocation4], 16  }
 0x22c   :  { %237 = vsyncadd [#allocation4], 4294967280 }
 0x22d   :  { %193 = vsyncpa [#allocation4], 1 }

</bundles_post_ra>
